<compile_context>
chip_gen: v5e
topology: v5e:2x2
jax: 0.10.0
libtpu: 0.0.40
codegen_flags: <defaults>
</compile_context>

<pallas_src>
import math

import jax
import jax.numpy as jnp
from jax.experimental import pallas as pl
from jax.experimental.pallas import tpu as pltpu


# ----------------------------------------------------------------------------
# `ada`: adaptive Hermite function system (standard VPNet choice).
# Only `phi` is needed for the forward pass (dphi / ind are backward-only).
# ----------------------------------------------------------------------------
def ada_hermite(n_in, n_out, params):
    """phi with shape (n_in, n_out): Hermite functions on a dilated/translated grid."""
    dilation, translation = params[0], params[1]
    m = jnp.arange(n_in, dtype=jnp.float32)
    t = dilation * (m - (n_in - 1) / 2.0) - translation  # (n_in,)

    funcs = []
    h_prev2 = jnp.zeros_like(t)
    h_prev1 = (math.pi ** -0.25) * jnp.exp(-0.5 * t * t)  # h_0
    funcs.append(h_prev1)
    for k in range(1, n_out):
        h_k = t * jnp.sqrt(2.0 / k) * h_prev1 - jnp.sqrt((k - 1) / k) * h_prev2
        funcs.append(h_k)
        h_prev2, h_prev1 = h_prev1, h_k
    return jnp.stack(funcs, axis=1)  # (n_in, n_out)


# ----------------------------------------------------------------------------
# Pallas kernel: one lane-dense matmul per row tile, y = x_packed @ P_blockdiag
# ----------------------------------------------------------------------------
def _vp_project_kernel(x_ref, p_ref, y_ref):
    y_ref[...] = jnp.dot(
        x_ref[...], p_ref[...], preferred_element_type=jnp.float32
    ).astype(y_ref.dtype)


def _round_up(a, b):
    return ((a + b - 1) // b) * b


def vp_project(x2d, proj, *, target_tile_rows=512):
    """Compute x2d @ proj row-wise.

    x2d:  (M, L) rows (M = batch*channels), proj: (L, L) projection matrix.
    Rows are packed `pack` at a time into 128-lane slabs; `proj` is replicated
    block-diagonally so one matmul applies it independently to each packed row.
    """
    M, L = x2d.shape
    assert proj.shape == (L, L)

    # Pack consecutive length-L rows into one lane-dense slab (L=16 -> pack=8, W=128).
    pack = 128 // L if (L <= 128 and 128 % L == 0) else 1
    W = pack * L

    if pack > 1:
        # Block-diagonal replication: Pb[p*L+l, q*L+k] = (p==q) * proj[l, k].
        eye = jnp.eye(pack, dtype=proj.dtype)
        p_blk = jnp.einsum("pq,lk->plqk", eye, proj).reshape(W, W)
    else:
        p_blk = proj

    # Packed-row tiling: tiles must be 8-sublane aligned; pad rows with zeros
    # (zero rows stay zero through the matmul and are sliced off afterwards).
    mp0 = -(-M // pack)                                   # packed rows before padding
    tile_rows = max(8, _round_up(min(target_tile_rows, _round_up(mp0, 8)), 8))
    mp = _round_up(mp0, tile_rows)

    x_pad = jnp.zeros((mp * pack, L), dtype=x2d.dtype).at[:M].set(x2d)
    x_packed = x_pad.reshape(mp, W)

    grid_m = mp // tile_rows
    y_packed = pl.pallas_call(
        _vp_project_kernel,
        out_shape=jax.ShapeDtypeStruct((mp, W), x2d.dtype),
        grid_spec=pltpu.PrefetchScalarGridSpec(
            num_scalar_prefetch=0,
            grid=(grid_m,),
            in_specs=[
                pl.BlockSpec((tile_rows, W), lambda i: (i, 0)),
                pl.BlockSpec((W, W), lambda i: (0, 0)),   # constant, stays resident
            ],
            out_specs=pl.BlockSpec((tile_rows, W), lambda i: (i, 0)),
        ),
        compiler_params=pltpu.CompilerParams(
            dimension_semantics=("parallel",)),           # megacore shard on v7x
    )(x_packed, p_blk)

    return y_packed.reshape(mp * pack, L)[:M]


# ----------------------------------------------------------------------------
# vp_layer_apr forward (module equivalent)
# ----------------------------------------------------------------------------
def vp_layer_apr_forward(x, weight, n_in, n_out):
    """x: (B, C, n_in) float32; weight: (2,) = [dilation, translation]."""
    B, C, L = x.shape
    assert L == n_in
    phi = ada_hermite(n_in, n_out, weight)                  # (n_in, n_out)
    # Normal-equations projector instead of SVD pinv:
    #   P = phip^T @ phi^T = (phi @ phip)^T = phi @ (phi^T phi)^-1 @ phi^T  (symmetric)
    gram = phi.T @ phi                                       # (n_out, n_out), tiny
    proj = phi @ jnp.linalg.solve(gram, phi.T)               # (n_in, n_in)
    # TODO(synk): bf16 input/output casting (f32 accumulate) would halve HBM bytes on
    # v6e/v7x; kept f32 here to preserve the module's float32 numerics.

    x2d = x.reshape(B * C, L)
    y2d = vp_project(x2d, proj)
    return y2d.reshape(B, C, L)


if __name__ == "__main__":
    # Small shapes consistent with the module: signal length n_in=16,
    # n_out=4 basis functions, batch=2, channels=4, nparams=2, init=[0.1, 0.0]
    B, C, n_in, n_out = 2, 4, 16, 4
    weight = jnp.array([0.1, 0.0], dtype=jnp.float32)        # nn.Parameter init

    key = jax.random.PRNGKey(0)
    x = jax.random.normal(key, (B, C, n_in), dtype=jnp.float32)

    y_est = vp_layer_apr_forward(x, weight, n_in, n_out)
    y_est = jax.block_until_ready(y_est)

    # Quiet correctness check against the pure-JAX reference of the PyTorch math
    # (pinv-based, exactly as the original module computes it).
    phi = ada_hermite(n_in, n_out, weight)
    phip = jnp.linalg.pinv(phi)
    coeffs_ref = jnp.einsum("kl,bcl->bkc", phip, x)           # phip @ x^T
    y_ref = jnp.einsum("lk,bkc->bcl", phi, coeffs_ref)        # (phi @ coeffs)^T
    assert y_est.shape == x.shape
    assert jnp.allclose(y_est, y_ref, atol=5e-4, rtol=1e-4)

    print("KERNEL_OK")
</pallas_src>

<mosaic_0001>
module attributes {stable_mosaic.version = 11 : i64} {
  func.func @_vp_project_kernel(%arg0: i32, %arg1: memref<8x128xf32, #tpu.memory_space<vmem>>, %arg2: memref<128x128xf32, #tpu.memory_space<vmem>>, %arg3: memref<8x128xf32, #tpu.memory_space<vmem>>) attributes {dimension_semantics = [#tpu.dimension_semantics<parallel>], iteration_bounds = array<i64: 1>, scalar_prefetch = 0 : i64, scratch_operands = 0 : i64, tpu.core_type = #tpu.core_type<tc>, window_params = [{transform_indices = @transform_0, window_bounds = array<i64: 8, 128>}, {pipeline_mode = #tpu.pipeline_mode<synchronous>, transform_indices = @transform_1, window_bounds = array<i64: 128, 128>}, {transform_indices = @transform_2, window_bounds = array<i64: 8, 128>}]} {
    %c0 = arith.constant 0 : index
    %c0_0 = arith.constant 0 : index
    %0 = vector.load %arg1[%c0, %c0_0] : memref<8x128xf32, #tpu.memory_space<vmem>>, vector<8x128xf32>
    %c0_1 = arith.constant 0 : index
    %c0_2 = arith.constant 0 : index
    %1 = vector.load %arg2[%c0_1, %c0_2] : memref<128x128xf32, #tpu.memory_space<vmem>>, vector<128x128xf32>
    %cst = arith.constant dense<0.000000e+00> : vector<8x128xf32>
    %2 = tpu.matmul %0, %1, %cst {dimension_numbers = #tpu.dot_dimension_numbers<[1], [0], [0], [1], [0, 0, 1, 1], [], []>} : vector<8x128xf32>, vector<128x128xf32>, vector<8x128xf32> -> vector<8x128xf32>
    %c0_3 = arith.constant 0 : index
    %c0_4 = arith.constant 0 : index
    %3 = vector.load %arg3[%c0_3, %c0_4] : memref<8x128xf32, #tpu.memory_space<vmem>>, vector<8x128xf32>
    tpu.vector_store %arg3[%c0_3, %c0_4], %2 {strides = array<i32>} : memref<8x128xf32, #tpu.memory_space<vmem>>, vector<8x128xf32>,
    return
  }
  func.func @transform_0(%arg0: i32) -> (i32, i32) {
    %c0_i32 = arith.constant 0 : i32
    %c0_i32_0 = arith.constant 0 : i32
    return %arg0, %c0_i32 : i32, i32
  }
  func.func @transform_1(%arg0: i32) -> (i32, i32) {
    %c0_i32 = arith.constant 0 : i32
    %c0_i32_0 = arith.constant 0 : i32
    %c0_i32_1 = arith.constant 0 : i32
    return %c0_i32, %c0_i32_0 : i32, i32
  }
  func.func @transform_2(%arg0: i32) -> (i32, i32) {
    %c0_i32 = arith.constant 0 : i32
    %c0_i32_0 = arith.constant 0 : i32
    return %arg0, %c0_i32 : i32, i32
  }
}

</mosaic_0001>

<bundles_post_ra>
// kernel: tpu_custom_call.1
= control target key start
LH: loop header
LB: loop body
LE: loop exit
PB: predicated region body
PF: predicated region fallthrough
CT: control target
= control target key end

     0   :  { %7 = vsyncpa [#allocation3], 0  ;;  %s210_s0 = inlined_call_operand.hbm [shape: f32[8,128], index: 0, kind: input, shape index: {}]   ;;  %s211_s1 = inlined_call_operand.hbm [shape: f32[128,128], index: 1, kind: input, shape index: {}]   ;;  %s212_s2 = inlined_call_operand.hbm [shape: f32[8,128], index: 2, kind: output, shape index: {}]  }
   0x1   :  { %8 = vsyncpa [#allocation6], 0 }
   0x2   :  { %9 = vsyncpa [#allocation4], 0  ;;  %s15_s11 = sshll.u32 %s210_s0, 4  ;;  %s181_s12 = smov [#allocation2]   ;;  %s16_s11 = int_to_ptr.hbm [resolvable:$true] %s15_s11 }
   0x3   :  { %s17_s13 = sshll.u32 %s181_s12, 4  ;;  %s25_s16 = sshll.u32 %s211_s1, 4  ;;  %s18_s13 = int_to_ptr.vmem [resolvable:$true] %s17_s13  ;;  %s26_s16 = int_to_ptr.hbm [resolvable:$true] %s25_s16 }
   0x4   :  { %20 = dma.hbm_to_vmem [thread:$0]  %s16_s11, 128, %s18_s13, [#allocation3]  }
   0x5   :  { %s182_s17 = smov [#allocation5]   ;;  %s183_s19 = smov 128  }
   0x6   :  { %s27_s18 = sshll.u32 %s182_s17, 4  ;;  %s184_s20 = smov 8   ;;  %s28_s18 = int_to_ptr.vmem [resolvable:$true] %s27_s18 }
   0x7   :  { %33 = dma.hbm_to_vmem [thread:$0]  %s26_s16, 2048, %s28_s18, [#allocation6], %s183_s19, %s183_s19, %s184_s20  }
   0x8   :  { %175 = dma.done.wait [#allocation3], 128  }
   0x9   :  { %176 = vsyncadd [#allocation3], 4294967168 }
   0xa   :  { %177 = dma.done.wait [#allocation6], 2048  }
   0xb   :  { %178 = vsyncadd [#allocation6], 4294965248  ;;  %v58_v0 = vld [vmem:[#allocation5 + $0x78] sm:$0xff]  ;;  %v57_v1 = vld [vmem:[#allocation5 + $0x70] sm:$0xff]  ;;  %s185_s0 = smov [#allocation7]   ;;  %s87_s23 = sshll.u32 %s212_s2, 4  ;;  %s88_s23 = int_to_ptr.hbm [resolvable:$true] %s87_s23 }
   0xc   :  { %59 = vmatpush.msra.mxu0 %v58_v0  ;;  %v56_v2 = vld [vmem:[#allocation5 + $0x68] sm:$0xff]  ;;  %v55_v3 = vld [vmem:[#allocation5 + $0x60] sm:$0xff]  ;;  %v54_v4 = vld [vmem:[#allocation5 + $0x58] sm:$0xff]  ;;  %s85_s1 = sshll.u32 %s185_s0, 4  ;;  %s86_s1 = int_to_ptr.vmem [resolvable:$true] %s85_s1 }
   0xd   :  { %v53_v5 = vld [vmem:[#allocation5 + $0x50] sm:$0xff]  ;;  %v52_v6 = vld [vmem:[#allocation5 + $0x48] sm:$0xff]  ;;  %v51_v7 = vld [vmem:[#allocation5 + $0x40] sm:$0xff] }
   0xe   :  { %60 = vmatpush.msra.mxu0 %v57_v1  ;;  %v50_v8 = vld [vmem:[#allocation5 + $0x38] sm:$0xff]  ;;  %v49_v9 = vld [vmem:[#allocation5 + $0x30] sm:$0xff]  ;;  %v48_v10 = vld [vmem:[#allocation5 + $0x28] sm:$0xff] }
   0xf   :  { %v47_v11 = vld [vmem:[#allocation5 + $0x20] sm:$0xff]  ;;  %v46_v12 = vld [vmem:[#allocation5 + $0x18] sm:$0xff]  ;;  %v45_v13 = vld [vmem:[#allocation5 + $0x10] sm:$0xff] }
  0x10   :  { %61 = vmatpush.msra.mxu0 %v56_v2  ;;  %v44_v14 = vld [vmem:[#allocation5 + $0x8] sm:$0xff]  ;;  %v43_v15 = vld [vmem:[#allocation5] sm:$0xff]  ;;  %v42_v16 = vld [vmem:[#allocation2] sm:$0xff] }
  0x12   :  { %62 = vmatpush.msra.mxu0 %v55_v3 }
  0x14   :  { %63 = vmatpush.msra.mxu0 %v54_v4 }
  0x16   :  { %64 = vmatpush.msra.mxu0 %v53_v5 }
  0x18   :  { %65 = vmatpush.msra.mxu0 %v52_v6 }
  0x1a   :  { %66 = vmatpush.msra.mxu0 %v51_v7 }
  0x1c   :  { %67 = vmatpush.msra.mxu0 %v50_v8 }
  0x1e   :  { %68 = vmatpush.msra.mxu0 %v49_v9 }
  0x20   :  { %69 = vmatpush.msra.mxu0 %v48_v10 }
  0x22   :  { %70 = vmatpush.msra.mxu0 %v47_v11 }
  0x24   :  { %71 = vmatpush.msra.mxu0 %v46_v12 }
  0x26   :  { %72 = vmatpush.msra.mxu0 %v45_v13 }
  0x28   :  { %73 = vmatpush.msra.mxu0 %v44_v14 }
  0x2a   :  { %74 = vmatpush.msra.mxu0 %v43_v15 }
  0x2b   :  { %75 = vmatmul.f32.vlgmr.msra.gmra.mxu0 %v42_v16 }
  0xa8   :  { %v76_v17 = vpop.f32.mrf.mxu0 }
  0xa9   :  { %79 = vst [vmem:[#allocation7] sm:$0xff] %v76_v17 }
  0xaa   :  { %90 = dma.vmem_to_hbm [thread:$0]  %s86_s1, 128, %s88_s23, [#allocation4]  }
  0xab   :  { %179 = dma.done.wait [#allocation4], 128  }
  0xac   :  { %180 = vsyncadd [#allocation4], 4294967168 }
  0xad   :  { %95 = vsyncpa [#allocation3], 1 }
  0xae   :  { %96 = vsyncpa [#allocation6], 1 }
  0xaf   :  { %97 = vsyncpa [#allocation4], 1 }

</bundles_post_ra>
